<compile_context>
chip_gen: v5e
topology: v5e:2x2
jax: 0.10.0
libtpu: 0.0.40
codegen_flags: <defaults>
</compile_context>

<pallas_src>
import functools

import jax
import jax.numpy as jnp
import numpy as np
from jax.experimental import pallas as pl
from jax.experimental.pallas import tpu as pltpu

LANE = 128          # channel padding granularity (lane width)
MAX_TM = 512        # rows per program (larger tiles -> ~85% of HBM roofline)
MAX_TN = 512        # output-channel tile (bounds weight block for v7x 64 MiB VMEM)
COMPUTE_DTYPE = jnp.bfloat16   # MXU-native; f32 accumulation inside the kernels
VMEM_LIMIT = 48 * 1024 * 1024  # headroom under v7x's 64 MiB physical VMEM


def _round_up(x, m):
    return (x + m - 1) // m * m


def _pad_to(a, shape):
    pads = [(0, t - s) for s, t in zip(a.shape, shape)]
    if all(p == (0, 0) for p in pads):
        return a
    return jnp.pad(a, pads)


# --------------------------- fused matmul kernel --------------------------- #
def _mm_bn_kernel(*refs, apply_relu, mode):
    """One (TM, TN) tile of  relu((x@w)*s + b  [+ shortcut]).

    mode: "plain"          -> no residual
          "add"            -> + residual tile (identity shortcut)
          "conv_shortcut"  -> + (xs@ws)*ss + bs  (projection shortcut, fused)
    """
    if mode == "plain":
        x_ref, w_ref, s_ref, b_ref, o_ref = refs
    elif mode == "add":
        x_ref, w_ref, s_ref, b_ref, r_ref, o_ref = refs
    else:  # "conv_shortcut"
        x_ref, w_ref, s_ref, b_ref, xs_ref, ws_ref, ss_ref, bs_ref, o_ref = refs

    y = jnp.dot(x_ref[...], w_ref[...], preferred_element_type=jnp.float32)
    y = y * s_ref[...] + b_ref[...]
    if mode == "add":
        y = y + r_ref[...].astype(jnp.float32)
    elif mode == "conv_shortcut":
        sc = jnp.dot(xs_ref[...], ws_ref[...], preferred_element_type=jnp.float32)
        y = y + sc * ss_ref[...] + bs_ref[...]
    if apply_relu:
        y = jnp.maximum(y, 0.0)
    o_ref[...] = y.astype(o_ref.dtype)


def matmul_bn(x, w, scale, bias, *, apply_relu=True, shortcut=None,
              out_dtype=jnp.float32):
    """Fused conv-as-matmul + folded BN (+ fused shortcut) (+ ReLU).

    x: (M, K)  w: (K, N)  scale/bias: (N,)    K, N must be multiples of 128.
    shortcut: None
              ("add", res[M, N])
              ("conv", xs[M, K2], ws[K2, N], ss[N], bs[N])
    Ragged M is padded; the padded rows are sliced off the result.
    """
    M, K = x.shape
    Kw, N = w.shape
    assert K == Kw and K % LANE == 0 and N % LANE == 0

    tm = min(MAX_TM, _round_up(M, 8))
    tn = min(MAX_TN, N)
    Mp = _round_up(M, tm)
    gm, gn = Mp // tm, N // tn
    # TODO(synk): add a K-reduction grid axis ("arbitrary" + VMEM accumulator) for
    #             late ResNet stages where a full (K, tn) weight block is too big.

    xw = _pad_to(x, (Mp, K)).astype(COMPUTE_DTYPE)
    ww = w.astype(COMPUTE_DTYPE)
    s2 = scale.reshape(1, N).astype(jnp.float32)
    b2 = bias.reshape(1, N).astype(jnp.float32)

    inputs = [xw, ww, s2, b2]
    in_specs = [
        pl.BlockSpec((tm, K), lambda i, j: (i, 0)),
        pl.BlockSpec((K, tn), lambda i, j: (0, j)),
        pl.BlockSpec((1, tn), lambda i, j: (0, j)),
        pl.BlockSpec((1, tn), lambda i, j: (0, j)),
    ]
    flops = 2 * Mp * K * N
    bytes_accessed = (xw.size + ww.size) * 2 + (s2.size + b2.size) * 4 \
        + Mp * N * jnp.dtype(out_dtype).itemsize

    if shortcut is None:
        mode = "plain"
    elif shortcut[0] == "add":
        mode = "add"
        res = _pad_to(shortcut[1], (Mp, N)).astype(COMPUTE_DTYPE)
        inputs.append(res)
        in_specs.append(pl.BlockSpec((tm, tn), lambda i, j: (i, j)))
        bytes_accessed += res.size * 2
    else:
        mode = "conv_shortcut"
        _, xs, ws, ss, bs = shortcut
        Ks = xs.shape[1]
        assert ws.shape == (Ks, N) and Ks % LANE == 0
        xs = _pad_to(xs, (Mp, Ks)).astype(COMPUTE_DTYPE)
        ws = ws.astype(COMPUTE_DTYPE)
        ss2 = ss.reshape(1, N).astype(jnp.float32)
        bs2 = bs.reshape(1, N).astype(jnp.float32)
        inputs += [xs, ws, ss2, bs2]
        in_specs += [
            pl.BlockSpec((tm, Ks), lambda i, j: (i, 0)),
            pl.BlockSpec((Ks, tn), lambda i, j: (0, j)),
            pl.BlockSpec((1, tn), lambda i, j: (0, j)),
            pl.BlockSpec((1, tn), lambda i, j: (0, j)),
        ]
        flops += 2 * Mp * Ks * N
        bytes_accessed += (xs.size + ws.size) * 2 + (ss2.size + bs2.size) * 4

    kernel = functools.partial(_mm_bn_kernel, apply_relu=apply_relu, mode=mode)
    out = pl.pallas_call(
        kernel,
        out_shape=jax.ShapeDtypeStruct((Mp, N), out_dtype),
        grid=(gm, gn),
        in_specs=in_specs,
        out_specs=pl.BlockSpec((tm, tn), lambda i, j: (i, j)),
        compiler_params=pltpu.CompilerParams(
            dimension_semantics=("parallel", "parallel"),
            vmem_limit_bytes=VMEM_LIMIT,
        ),
        cost_estimate=pl.CostEstimate(
            flops=flops, transcendentals=0, bytes_accessed=int(bytes_accessed)),
    )(*inputs)
    return out[:M]


# ------------------------ conv2 (3x3) kernel, no im2col --------------------- #
def _conv3x3_bn_kernel(x_ref, w_ref, s_ref, b_ref, o_ref, *, stride, out_hw):
    """3x3 conv (pad=1, stride) + folded BN + ReLU for one image.

    x_ref: (1, s, s, Hph, Wph, C) phase-split padded input (bf16)
    w_ref: (3, 3, C, Cout)        weights (bf16)
    o_ref: (Ho*Wo, Cout)          output rows for this image
    The 9 taps accumulate in f32 on the MXU; no im2col buffer ever hits HBM.
    """
    Ho, Wo = out_hw
    s = stride
    acc = None
    for kh in range(3):
        for kw in range(3):
            win = x_ref[0, kh % s, kw % s,
                        kh // s: kh // s + Ho,
                        kw // s: kw // s + Wo, :]            # (Ho, Wo, C)
            win = win.reshape(Ho * Wo, win.shape[-1])
            part = jnp.dot(win, w_ref[kh, kw],
                           preferred_element_type=jnp.float32)
            acc = part if acc is None else acc + part
    y = acc * s_ref[...] + b_ref[...]
    y = jnp.maximum(y, 0.0)
    o_ref[...] = y.astype(o_ref.dtype)


def conv3x3_bn_relu(y1, w2, scale, bias, stride):
    """y1: (N, H, W, C) NHWC (C mult of 128). w2: (3, 3, C, Cout) (Cout mult of 128).

    Returns (N*Ho*Wo, Cout) rows (bf16) and (Ho, Wo).
    """
    N, H, W, C = y1.shape
    Cout = w2.shape[-1]
    s = stride
    Ho = (H + 2 - 3) // s + 1
    Wo = (W + 2 - 3) // s + 1
    assert (Ho * Wo) % 8 == 0  # TODO(synk): pad rows for ragged spatial sizes

    # pad=1 spatially, then "phase split" so strided taps become contiguous slices:
    # xs[n, ph, pw, qh, qw, c] = padded[n, qh*s + ph, qw*s + pw, c]
    xp = jnp.pad(y1, ((0, 0), (1, 1), (1, 1), (0, 0)))
    Hp2, Wp2 = _round_up(H + 2, s), _round_up(W + 2, s)
    xp = _pad_to(xp, (N, Hp2, Wp2, C))
    Hph, Wph = Hp2 // s, Wp2 // s
    xs = xp.reshape(N, Hph, s, Wph, s, C).transpose(0, 2, 4, 1, 3, 5)
    xs = xs.astype(COMPUTE_DTYPE)

    ww = w2.astype(COMPUTE_DTYPE)
    s2 = scale.reshape(1, Cout).astype(jnp.float32)
    b2 = bias.reshape(1, Cout).astype(jnp.float32)

    kernel = functools.partial(_conv3x3_bn_kernel, stride=s, out_hw=(Ho, Wo))
    out = pl.pallas_call(
        kernel,
        out_shape=jax.ShapeDtypeStruct((N * Ho * Wo, Cout), COMPUTE_DTYPE),
        grid=(N,),
        in_specs=[
            pl.BlockSpec((1, s, s, Hph, Wph, C), lambda n: (n, 0, 0, 0, 0, 0)),
            pl.BlockSpec((3, 3, C, Cout), lambda n: (0, 0, 0, 0)),
            pl.BlockSpec((1, Cout), lambda n: (0, 0)),
            pl.BlockSpec((1, Cout), lambda n: (0, 0)),
        ],
        out_specs=pl.BlockSpec((Ho * Wo, Cout), lambda n: (n, 0)),
        compiler_params=pltpu.CompilerParams(
            dimension_semantics=("parallel",),
            vmem_limit_bytes=VMEM_LIMIT,
        ),
        cost_estimate=pl.CostEstimate(
            flops=2 * N * Ho * Wo * 9 * C * Cout, transcendentals=0,
            bytes_accessed=int((xs.size + ww.size + N * Ho * Wo * Cout) * 2
                               + (s2.size + b2.size) * 4)),
    )(xs, ww, s2, b2)
    return out, (Ho, Wo)


# ------------------------------- JAX glue ---------------------------------- #
def fold_bn(bn_params, eps=1e-5):
    gamma, beta, mean, var = bn_params
    scale = gamma / jnp.sqrt(var + eps)
    return scale, beta - mean * scale


def bottleneck_forward(x_nchw, params, stride):
    """Mirror of Bottleneck.forward (inference-mode BN), bf16 compute / f32 accum."""
    x = jnp.transpose(x_nchw, (0, 2, 3, 1))  # NCHW -> NHWC
    N, H, W, Cin = x.shape

    w1 = params["conv1_w"]                    # (planes, Cin, 1, 1)
    planes = w1.shape[0]
    Cout = 4 * planes
    Cin_p, Cpl_p, Cout_p = (_round_up(c, LANE) for c in (Cin, planes, Cout))

    # fold the BN running stats once
    s1, b1 = fold_bn(params["bn1"])
    s2, b2 = fold_bn(params["bn2"])
    s3, b3 = fold_bn(params["bn3"])

    # lane-dense channel padding (zeros through conv/BN/ReLU stay zeros)
    xpad = _pad_to(x, (N, H, W, Cin_p)).astype(COMPUTE_DTYPE)

    # conv1 (1x1) + bn1 + relu
    w1m = _pad_to(w1.reshape(planes, Cin).T, (Cin_p, Cpl_p))
    y1 = matmul_bn(xpad.reshape(N * H * W, Cin_p), w1m,
                   _pad_to(s1, (Cpl_p,)), _pad_to(b1, (Cpl_p,)),
                   apply_relu=True, out_dtype=COMPUTE_DTYPE)
    y1 = y1.reshape(N, H, W, Cpl_p)

    # conv2 (3x3, stride, pad=1) + bn2 + relu — no materialized im2col
    w2 = params["conv2_w"]                    # (planes, planes, 3, 3) OIHW
    w2m = _pad_to(jnp.transpose(w2, (2, 3, 1, 0)), (3, 3, Cpl_p, Cpl_p))
    y2, (Ho, Wo) = conv3x3_bn_relu(y1, w2m,
                                   _pad_to(s2, (Cpl_p,)), _pad_to(b2, (Cpl_p,)),
                                   stride)
    M2 = N * Ho * Wo

    # conv3 (1x1) + bn3 + shortcut + relu, all fused in one kernel
    w3 = params["conv3_w"]                    # (Cout, planes, 1, 1)
    w3m = _pad_to(w3.reshape(Cout, planes).T, (Cpl_p, Cout_p))
    if stride != 1 or Cin != Cout:
        ws = params["short_w"]                # (Cout, Cin, 1, 1)
        ssc, bsc = fold_bn(params["short_bn"])
        wsm = _pad_to(ws.reshape(Cout, Cin).T, (Cin_p, Cout_p))
        x_sub = xpad[:, ::stride, ::stride, :].reshape(M2, Cin_p)
        shortcut = ("conv", x_sub, wsm,
                    _pad_to(ssc, (Cout_p,)), _pad_to(bsc, (Cout_p,)))
    else:
        shortcut = ("add", xpad.reshape(M2, Cin_p))

    y3 = matmul_bn(y2, w3m, _pad_to(s3, (Cout_p,)), _pad_to(b3, (Cout_p,)),
                   apply_relu=True, shortcut=shortcut, out_dtype=jnp.float32)

    out = y3.reshape(N, Ho, Wo, Cout_p)[..., :Cout]
    return jnp.transpose(out, (0, 3, 1, 2))   # NHWC -> NCHW


# ---------------------------- Pure-JAX reference --------------------------- #
def ref_forward(x_nchw, params, stride):
    def conv(x, w, s=1, p=0):
        return jax.lax.conv_general_dilated(
            x, w, (s, s), [(p, p), (p, p)],
            dimension_numbers=("NCHW", "OIHW", "NCHW"),
        )

    def bn(x, bn_params):
        g, b, m, v = bn_params
        s = g / jnp.sqrt(v + 1e-5)
        return x * s[None, :, None, None] + (b - m * s)[None, :, None, None]

    out = jax.nn.relu(bn(conv(x_nchw, params["conv1_w"]), params["bn1"]))
    out = jax.nn.relu(bn(conv(out, params["conv2_w"], stride, 1), params["bn2"]))
    out = bn(conv(out, params["conv3_w"]), params["bn3"])
    sc = bn(conv(x_nchw, params["short_w"], stride), params["short_bn"])
    return jax.nn.relu(out + sc)


# ---------------------------------- main ----------------------------------- #
def make_params(key, in_planes, planes):
    expansion = 4
    Cout = expansion * planes
    keys = jax.random.split(key, 16)

    def bn_params(k, c):
        k0, k1, k2, k3 = jax.random.split(k, 4)
        gamma = jax.random.uniform(k0, (c,), jnp.float32, 0.5, 1.5)
        beta = jax.random.normal(k1, (c,), jnp.float32) * 0.1
        mean = jax.random.normal(k2, (c,), jnp.float32) * 0.1
        var = jax.random.uniform(k3, (c,), jnp.float32, 0.5, 1.5)
        return (gamma, beta, mean, var)

    return {
        "conv1_w": jax.random.normal(keys[0], (planes, in_planes, 1, 1), jnp.float32) * 0.2,
        "bn1": bn_params(keys[1], planes),
        "conv2_w": jax.random.normal(keys[2], (planes, planes, 3, 3), jnp.float32) * 0.1,
        "bn2": bn_params(keys[3], planes),
        "conv3_w": jax.random.normal(keys[4], (Cout, planes, 1, 1), jnp.float32) * 0.2,
        "bn3": bn_params(keys[5], Cout),
        "short_w": jax.random.normal(keys[6], (Cout, in_planes, 1, 1), jnp.float32) * 0.2,
        "short_bn": bn_params(keys[7], Cout),
    }


if __name__ == "__main__":
    in_planes, planes, stride = 4, 4, 2
    key = jax.random.PRNGKey(0)
    kx, kp = jax.random.split(key)
    x = jax.random.normal(kx, (2, in_planes, 16, 16), jnp.float32)  # NCHW like PyTorch
    params = make_params(kp, in_planes, planes)

    out = jax.block_until_ready(bottleneck_forward(x, params, stride))
    ref = jax.block_until_ready(ref_forward(x, params, stride))

    assert out.shape == (2, 4 * planes, 8, 8), out.shape
    # bf16 MXU compute with f32 accumulation -> looser tolerance than the f32 ref.
    np.testing.assert_allclose(np.asarray(out), np.asarray(ref), rtol=5e-2, atol=5e-2)

    print("KERNEL_OK")
</pallas_src>

<mosaic_0001>
module attributes {stable_mosaic.version = 11 : i64} {
  func.func @_mm_bn_kernel(%arg0: i32, %arg1: i32, %arg2: memref<512x128xbf16, #tpu.memory_space<vmem>>, %arg3: memref<128x128xbf16, #tpu.memory_space<vmem>>, %arg4: memref<1x128xf32, #tpu.memory_space<vmem>>, %arg5: memref<1x128xf32, #tpu.memory_space<vmem>>, %arg6: memref<512x128xbf16, #tpu.memory_space<vmem>>) attributes {dimension_semantics = [#tpu.dimension_semantics<parallel>, #tpu.dimension_semantics<parallel>], iteration_bounds = array<i64: 1, 1>, scalar_prefetch = 0 : i64, scratch_operands = 0 : i64, tpu.core_type = #tpu.core_type<tc>, window_params = [{transform_indices = @transform_0, window_bounds = array<i64: 512, 128>}, {transform_indices = @transform_1, window_bounds = array<i64: 128, 128>}, {transform_indices = @transform_2, window_bounds = array<i64: 1, 128>}, {transform_indices = @transform_3, window_bounds = array<i64: 1, 128>}, {transform_indices = @transform_4, window_bounds = array<i64: 512, 128>}]} {
    %c0 = arith.constant 0 : index
    %c0_0 = arith.constant 0 : index
    %0 = vector.load %arg2[%c0, %c0_0] : memref<512x128xbf16, #tpu.memory_space<vmem>>, vector<512x128xbf16>
    %c0_1 = arith.constant 0 : index
    %c0_2 = arith.constant 0 : index
    %1 = vector.load %arg3[%c0_1, %c0_2] : memref<128x128xbf16, #tpu.memory_space<vmem>>, vector<128x128xbf16>
    %cst = arith.constant dense<0.000000e+00> : vector<512x128xf32>
    %2 = tpu.matmul %0, %1, %cst {dimension_numbers = #tpu.dot_dimension_numbers<[1], [0], [0], [1], [0, 0, 1, 1], [], []>} : vector<512x128xbf16>, vector<128x128xbf16>, vector<512x128xf32> -> vector<512x128xf32>
    %c0_3 = arith.constant 0 : index
    %c0_4 = arith.constant 0 : index
    %3 = vector.load %arg4[%c0_3, %c0_4] : memref<1x128xf32, #tpu.memory_space<vmem>>, vector<1x128xf32>
    %4 = vector.broadcast %3 : vector<1x128xf32> to vector<512x128xf32>
    %5 = arith.mulf %2, %4 : vector<512x128xf32>
    %c0_5 = arith.constant 0 : index
    %c0_6 = arith.constant 0 : index
    %6 = vector.load %arg5[%c0_5, %c0_6] : memref<1x128xf32, #tpu.memory_space<vmem>>, vector<1x128xf32>
    %7 = vector.broadcast %6 : vector<1x128xf32> to vector<512x128xf32>
    %8 = arith.addf %5, %7 : vector<512x128xf32>
    %cst_7 = arith.constant 0.000000e+00 : f32
    %9 = vector.broadcast %cst_7 : f32 to vector<512x128xf32>
    %10 = arith.maximumf %8, %9 : vector<512x128xf32>
    %11 = arith.truncf %10 : vector<512x128xf32> to vector<512x128xbf16>
    %c0_8 = arith.constant 0 : index
    %c0_9 = arith.constant 0 : index
    %12 = vector.load %arg6[%c0_8, %c0_9] : memref<512x128xbf16, #tpu.memory_space<vmem>>, vector<512x128xbf16>
    tpu.vector_store %arg6[%c0_8, %c0_9], %11 {strides = array<i32>} : memref<512x128xbf16, #tpu.memory_space<vmem>>, vector<512x128xbf16>,
    return
  }
  func.func @transform_0(%arg0: i32, %arg1: i32) -> (i32, i32) {
    %c0_i32 = arith.constant 0 : i32
    %c0_i32_0 = arith.constant 0 : i32
    return %arg0, %c0_i32 : i32, i32
  }
  func.func @transform_1(%arg0: i32, %arg1: i32) -> (i32, i32) {
    %c0_i32 = arith.constant 0 : i32
    %c0_i32_0 = arith.constant 0 : i32
    return %c0_i32, %arg1 : i32, i32
  }
  func.func @transform_2(%arg0: i32, %arg1: i32) -> (i32, i32) {
    %c0_i32 = arith.constant 0 : i32
    %c0_i32_0 = arith.constant 0 : i32
    return %c0_i32, %arg1 : i32, i32
  }
  func.func @transform_3(%arg0: i32, %arg1: i32) -> (i32, i32) {
    %c0_i32 = arith.constant 0 : i32
    %c0_i32_0 = arith.constant 0 : i32
    return %c0_i32, %arg1 : i32, i32
  }
  func.func @transform_4(%arg0: i32, %arg1: i32) -> (i32, i32) {
    %c0_i32 = arith.constant 0 : i32
    return %arg0, %arg1 : i32, i32
  }
}

</mosaic_0001>

<bundles_post_ra>
// kernel: tpu_custom_call.1
= control target key start
LH: loop header
LB: loop body
LE: loop exit
PB: predicated region body
PF: predicated region fallthrough
CT: control target
= control target key end

     0   :  { %9 = vsyncpa [#allocation3], 0  ;;  %s1573_s0 = inlined_call_operand.hbm [shape: bf16[512,128], index: 0, kind: input, shape index: {}]   ;;  %s1574_s1 = inlined_call_operand.hbm [shape: bf16[128,128], index: 1, kind: input, shape index: {}]   ;;  %s1575_s2 = inlined_call_operand.vmem [shape: f32[1,128], index: 2, kind: input, shape index: {}]   ;;  %s1576_s3 = inlined_call_operand.vmem [shape: f32[1,128], index: 3, kind: input, shape index: {}]   ;;  %s1577_s4 = inlined_call_operand.hbm [shape: bf16[512,128], index: 4, kind: output, shape index: {}]  }
   0x1   :  { %10 = vsyncpa [#allocation6], 0 }
   0x2   :  { %11 = vsyncpa [#allocation4], 0  ;;  %s16_s17 = sshll.u32 %s1573_s0, 4  ;;  %s1387_s18 = smov [#allocation2]   ;;  %s17_s17 = int_to_ptr.hbm [resolvable:$true] %s16_s17 }
   0x3   :  { %s18_s19 = sshll.u32 %s1387_s18, 4  ;;  %s29_s22 = sshll.u32 %s1574_s1, 4  ;;  %s19_s19 = int_to_ptr.vmem [resolvable:$true] %s18_s19  ;;  %s30_s22 = int_to_ptr.hbm [resolvable:$true] %s29_s22 }
   0x4   :  { %s1388_s23 = smov 64   ;;  %s1389_s24 = smov 4  }
   0x5   :  { %24 = dma.hbm_to_vmem [thread:$0]  %s17_s17, 4096, %s19_s19, [#allocation3], %s1388_s23, %s1388_s23, %s1389_s24  }
   0x6   :  { %s1390_s25 = smov [#allocation5]  }
   0x7   :  { %s31_s26 = sshll.u32 %s1390_s25, 4  ;;  %s32_s26 = int_to_ptr.vmem [resolvable:$true] %s31_s26 }
   0x8   :  { %37 = dma.hbm_to_vmem [thread:$0]  %s30_s22, 1024, %s32_s26, [#allocation6], %s1388_s23, %s1388_s23, %s1389_s24  }
   0x9   :  { %1381 = dma.done.wait [#allocation3], 4096  }
   0xa   :  { %1382 = vsyncadd [#allocation3], 4294963200 }
   0xb   :  { %1383 = dma.done.wait [#allocation6], 1024  }
   0xc   :  { %1384 = vsyncadd [#allocation6], 4294966272  ;;  %v1086_v0 = vld [vmem:[#allocation5 + $0x38] sm:$0xff]  ;;  %v1085_v1 = vld [vmem:[#allocation5 + $0x30] sm:$0xff]  ;;  %s873_s5 = sshll.u32 %s1577_s4, 4  ;;  %s874_s5 = int_to_ptr.hbm [resolvable:$true] %s873_s5 }
   0xd   :  { %370 = vmatpush.bf16.msra.mxu0 %v1086_v0  ;;  %1278 = vmatpush.bf16.msra.mxu1 %v1086_v0  ;;  %v1084_v2 = vld [vmem:[#allocation5 + $0x28] sm:$0xff]  ;;  %v1083_v3 = vld [vmem:[#allocation5 + $0x20] sm:$0xff]  ;;  %v1082_v4 = vld [vmem:[#allocation5 + $0x18] sm:$0xff] }
   0xe   :  { %1279 = vmatpush.bf16.msra.mxu2 %v1086_v0  ;;  %1280 = vmatpush.bf16.msra.mxu3 %v1086_v0  ;;  %v1081_v5 = vld [vmem:[#allocation5 + $0x10] sm:$0xff]  ;;  %v1080_v6 = vld [vmem:[#allocation5 + $0x8] sm:$0xff]  ;;  %v1079_v7 = vld [vmem:[#allocation5] sm:$0xff] }
   0xf   :  { %v1047_v8 = vld [vmem:[#allocation2] sm:$0xff]  ;;  %v1048_v12 = vld [vmem:[#allocation2 + $0x8] sm:$0xff]  ;;  %v1049_v16 = vld [vmem:[#allocation2 + $0x10] sm:$0xff] }
  0x10   :  { %v1055_v9 = vld [vmem:[#allocation2 + $0x40] sm:$0xff]  ;;  %v1056_v13 = vld [vmem:[#allocation2 + $0x48] sm:$0xff]  ;;  %v1057_v17 = vld [vmem:[#allocation2 + $0x50] sm:$0xff] }
  0x11   :  { %371 = vmatpush.bf16.msra.mxu0 %v1085_v1  ;;  %1281 = vmatpush.bf16.msra.mxu1 %v1085_v1  ;;  %v1063_v10 = vld [vmem:[#allocation2 + $0x80] sm:$0xff]  ;;  %v1064_v14 = vld [vmem:[#allocation2 + $0x88] sm:$0xff]  ;;  %v1065_v18 = vld [vmem:[#allocation2 + $0x90] sm:$0xff] }
  0x12   :  { %1282 = vmatpush.bf16.msra.mxu2 %v1085_v1  ;;  %1283 = vmatpush.bf16.msra.mxu3 %v1085_v1  ;;  %v1071_v11 = vld [vmem:[#allocation2 + $0xc0] sm:$0xff]  ;;  %v1072_v15 = vld [vmem:[#allocation2 + $0xc8] sm:$0xff]  ;;  %v1073_v19 = vld [vmem:[#allocation2 + $0xd0] sm:$0xff] }
  0x13   :  { %v1050_v20 = vld [vmem:[#allocation2 + $0x18] sm:$0xff]  ;;  %v1051_v24 = vld [vmem:[#allocation2 + $0x20] sm:$0xff]  ;;  %v1052_v28 = vld [vmem:[#allocation2 + $0x28] sm:$0xff] }
  0x14   :  { %v1058_v21 = vld [vmem:[#allocation2 + $0x58] sm:$0xff]  ;;  %v1059_v25 = vld [vmem:[#allocation2 + $0x60] sm:$0xff]  ;;  %v1060_v29 = vld [vmem:[#allocation2 + $0x68] sm:$0xff] }
  0x15   :  { %372 = vmatpush.bf16.msra.mxu0 %v1084_v2  ;;  %1284 = vmatpush.bf16.msra.mxu1 %v1084_v2  ;;  %v1066_v22 = vld [vmem:[#allocation2 + $0x98] sm:$0xff]  ;;  %v1067_v26 = vld [vmem:[#allocation2 + $0xa0] sm:$0xff]  ;;  %v1068_v30 = vld [vmem:[#allocation2 + $0xa8] sm:$0xff] }
  0x16   :  { %1285 = vmatpush.bf16.msra.mxu2 %v1084_v2  ;;  %1286 = vmatpush.bf16.msra.mxu3 %v1084_v2  ;;  %v1074_v23 = vld [vmem:[#allocation2 + $0xd8] sm:$0xff]  ;;  %v1075_v27 = vld [vmem:[#allocation2 + $0xe0] sm:$0xff]  ;;  %v1076_v31 = vld [vmem:[#allocation2 + $0xe8] sm:$0xff] }
  0x17   :  { %v1053_v32 = vld [vmem:[#allocation2 + $0x30] sm:$0xff]  ;;  %v1054_v36 = vld [vmem:[#allocation2 + $0x38] sm:$0xff]  ;;  %v1432_v42 = vld [vmem:[%s1575_s2] ss:$0 sm:$0xff]  ;;  %s1391_s2 = smov [#allocation7]  }
  0x18   :  { %v1061_v33 = vld [vmem:[#allocation2 + $0x70] sm:$0xff]  ;;  %v1062_v37 = vld [vmem:[#allocation2 + $0x78] sm:$0xff]  ;;  %v1438_v44 = vld [vmem:[%s1576_s3] ss:$0 sm:$0xff]  ;;  %s871_s3 = sshll.u32 %s1391_s2, 4  ;;  %s872_s3 = int_to_ptr.vmem [resolvable:$true] %s871_s3 }
  0x19   :  { %373 = vmatpush.bf16.msra.mxu0 %v1083_v3  ;;  %1287 = vmatpush.bf16.msra.mxu1 %v1083_v3  ;;  %v1069_v34 = vld [vmem:[#allocation2 + $0xb0] sm:$0xff]  ;;  %v1070_v38 = vld [vmem:[#allocation2 + $0xb8] sm:$0xff] }
  0x1a   :  { %1288 = vmatpush.bf16.msra.mxu2 %v1083_v3  ;;  %1289 = vmatpush.bf16.msra.mxu3 %v1083_v3  ;;  %v1077_v35 = vld [vmem:[#allocation2 + $0xf0] sm:$0xff]  ;;  %v1078_v39 = vld [vmem:[#allocation2 + $0xf8] sm:$0xff] }
  0x1d   :  { %374 = vmatpush.bf16.msra.mxu0 %v1082_v4  ;;  %1290 = vmatpush.bf16.msra.mxu1 %v1082_v4 }
  0x1e   :  { %1291 = vmatpush.bf16.msra.mxu2 %v1082_v4  ;;  %1292 = vmatpush.bf16.msra.mxu3 %v1082_v4 }
  0x21   :  { %375 = vmatpush.bf16.msra.mxu0 %v1081_v5  ;;  %1293 = vmatpush.bf16.msra.mxu1 %v1081_v5 }
  0x22   :  { %1294 = vmatpush.bf16.msra.mxu2 %v1081_v5  ;;  %1295 = vmatpush.bf16.msra.mxu3 %v1081_v5 }
  0x25   :  { %376 = vmatpush.bf16.msra.mxu0 %v1080_v6  ;;  %1296 = vmatpush.bf16.msra.mxu1 %v1080_v6 }
  0x26   :  { %1297 = vmatpush.bf16.msra.mxu2 %v1080_v6  ;;  %1298 = vmatpush.bf16.msra.mxu3 %v1080_v6 }
  0x29   :  { %377 = vmatpush.bf16.msra.mxu0 %v1079_v7  ;;  %1299 = vmatpush.bf16.msra.mxu1 %v1079_v7 }
  0x2a   :  { %1300 = vmatpush.bf16.msra.mxu2 %v1079_v7  ;;  %1301 = vmatpush.bf16.msra.mxu3 %v1079_v7 }
  0x2c   :  { %378 = vmatmul.bf16.vlgmr.msra.gmra.mxu0 %v1047_v8  ;;  %418 = vmatmul.bf16.vlgmr.msra.gmra.mxu1 %v1055_v9 }
  0x2d   :  { %458 = vmatmul.bf16.vlgmr.msra.gmra.mxu2 %v1063_v10  ;;  %498 = vmatmul.bf16.vlgmr.msra.gmra.mxu3 %v1071_v11 }
  0x3c   :  { %383 = vmatmul.bf16.gmra.mxu0 %v1048_v12  ;;  %423 = vmatmul.bf16.gmra.mxu1 %v1056_v13 }
  0x3d   :  { %463 = vmatmul.bf16.gmra.mxu2 %v1064_v14  ;;  %503 = vmatmul.bf16.gmra.mxu3 %v1072_v15 }
  0x4c   :  { %388 = vmatmul.bf16.gmra.mxu0 %v1049_v16  ;;  %428 = vmatmul.bf16.gmra.mxu1 %v1057_v17 }
  0x4d   :  { %468 = vmatmul.bf16.gmra.mxu2 %v1065_v18  ;;  %508 = vmatmul.bf16.gmra.mxu3 %v1073_v19 }
  0x5c   :  { %393 = vmatmul.bf16.gmra.mxu0 %v1050_v20  ;;  %433 = vmatmul.bf16.gmra.mxu1 %v1058_v21 }
  0x5d   :  { %473 = vmatmul.bf16.gmra.mxu2 %v1066_v22  ;;  %513 = vmatmul.bf16.gmra.mxu3 %v1074_v23 }
  0x6c   :  { %398 = vmatmul.bf16.gmra.mxu0 %v1051_v24  ;;  %438 = vmatmul.bf16.gmra.mxu1 %v1059_v25 }
  0x6d   :  { %478 = vmatmul.bf16.gmra.mxu2 %v1067_v26  ;;  %518 = vmatmul.bf16.gmra.mxu3 %v1075_v27 }
  0x7c   :  { %403 = vmatmul.bf16.gmra.mxu0 %v1052_v28  ;;  %443 = vmatmul.bf16.gmra.mxu1 %v1060_v29 }
  0x7d   :  { %483 = vmatmul.bf16.gmra.mxu2 %v1068_v30  ;;  %523 = vmatmul.bf16.gmra.mxu3 %v1076_v31 }
  0x8c   :  { %408 = vmatmul.bf16.gmra.mxu0 %v1053_v32  ;;  %448 = vmatmul.bf16.gmra.mxu1 %v1061_v33 }
  0x8d   :  { %488 = vmatmul.bf16.gmra.mxu2 %v1069_v34  ;;  %528 = vmatmul.bf16.gmra.mxu3 %v1077_v35 }
  0x9c   :  { %413 = vmatmul.bf16.gmra.mxu0 %v1054_v36  ;;  %453 = vmatmul.bf16.gmra.mxu1 %v1062_v37 }
  0x9d   :  { %493 = vmatmul.bf16.gmra.mxu2 %v1070_v38  ;;  %533 = vmatmul.bf16.gmra.mxu3 %v1078_v39 }
  0xa9   :  { %v379_v40 = vpop.f32.mrf.mxu0  ;;  %v419_v41 = vpop.f32.mrf.mxu1 }
  0xaa   :  { %v543_v43 = vmul.f32 %v1432_v42, %v379_v40  ;;  %v559_v45 = vmul.f32 %v1432_v42, %v419_v41 }
  0xac   :  { %v611_v50 = vadd.f32 %v1438_v44, %v543_v43  ;;  %v627_v51 = vadd.f32 %v1438_v44, %v559_v45 }
  0xae   :  { %v675_v58 = vmax.f32 %v611_v50, 0.0  ;;  %v691_v59 = vmax.f32 %v627_v51, 0.0 }
  0xb0   :  { %v459_v46 = vpop.f32.mrf.mxu2  ;;  %v499_v47 = vpop.f32.mrf.mxu3 }
  0xb1   :  { %v381_v48 = vpop.f32.mrf.mxu0  ;;  %v421_v49 = vpop.f32.mrf.mxu1  ;;  %v575_v56 = vmul.f32 %v1432_v42, %v459_v46  ;;  %v591_v57 = vmul.f32 %v1432_v42, %v499_v47 }
  0xb2   :  { %v544_v52 = vmul.f32 %v1432_v42, %v381_v48  ;;  %v560_v53 = vmul.f32 %v1432_v42, %v421_v49 }
  0xb3   :  { %v643_v2 = vadd.f32 %v1438_v44, %v575_v56  ;;  %v659_v3 = vadd.f32 %v1438_v44, %v591_v57 }
  0xb4   :  { %v612_v54 = vadd.f32 %v1438_v44, %v544_v52  ;;  %v628_v55 = vadd.f32 %v1438_v44, %v560_v53 }
  0xb5   :  { %v707_v10 = vmax.f32 %v643_v2, 0.0  ;;  %v723_v11 = vmax.f32 %v659_v3, 0.0 }
  0xb6   :  { %v676_v60 = vmax.f32 %v612_v54, 0.0  ;;  %v692_v61 = vmax.f32 %v628_v55, 0.0 }
  0xb8   :  { %v1090_v62 = vpack.c.bf16 %v676_v60, %v675_v58  ;;  %v1130_v63 = vpack.c.bf16 %v692_v61, %v691_v59  ;;  %v461_v0 = vpop.f32.mrf.mxu2  ;;  %v501_v1 = vpop.f32.mrf.mxu3 }
  0xb9   :  { %v576_v4 = vmul.f32 %v1432_v42, %v461_v0  ;;  %v592_v5 = vmul.f32 %v1432_v42, %v501_v1  ;;  %v384_v6 = vpop.f32.mrf.mxu0  ;;  %v424_v7 = vpop.f32.mrf.mxu1 }
  0xba   :  { %1091 = vst [vmem:[#allocation7] sm:$0xff] %v1090_v62   ;;  %v545_v14 = vmul.f32 %v1432_v42, %v384_v6  ;;  %v561_v15 = vmul.f32 %v1432_v42, %v424_v7 }
  0xbb   :  { %1254 = vst [vmem:[#allocation7 + $0x40] sm:$0xff] %v1130_v63   ;;  %v644_v8 = vadd.f32 %v1438_v44, %v576_v4  ;;  %v660_v9 = vadd.f32 %v1438_v44, %v592_v5 }
  0xbc   :  { %v613_v22 = vadd.f32 %v1438_v44, %v545_v14  ;;  %v629_v23 = vadd.f32 %v1438_v44, %v561_v15 }
  0xbd   :  { %v708_v12 = vmax.f32 %v644_v8, 0.0  ;;  %v724_v13 = vmax.f32 %v660_v9, 0.0 }
  0xbe   :  { %v677_v30 = vmax.f32 %v613_v22, 0.0  ;;  %v693_v31 = vmax.f32 %v629_v23, 0.0 }
  0xbf   :  { %v1170_v16 = vpack.c.bf16 %v708_v12, %v707_v10  ;;  %v1210_v17 = vpack.c.bf16 %v724_v13, %v723_v11 }
  0xc0   :  { %v464_v18 = vpop.f32.mrf.mxu2  ;;  %v504_v19 = vpop.f32.mrf.mxu3 }
  0xc1   :  { %1262 = vst [vmem:[#allocation7 + $0x80] sm:$0xff] %v1170_v16   ;;  %v386_v20 = vpop.f32.mrf.mxu0  ;;  %v426_v21 = vpop.f32.mrf.mxu1  ;;  %v577_v28 = vmul.f32 %v1432_v42, %v464_v18  ;;  %v593_v29 = vmul.f32 %v1432_v42, %v504_v19 }
  0xc2   :  { %1270 = vst [vmem:[#allocation7 + $0xc0] sm:$0xff] %v1210_v17   ;;  %v546_v24 = vmul.f32 %v1432_v42, %v386_v20  ;;  %v562_v25 = vmul.f32 %v1432_v42, %v426_v21 }
  0xc3   :  { %v645_v38 = vadd.f32 %v1438_v44, %v577_v28  ;;  %v661_v39 = vadd.f32 %v1438_v44, %v593_v29 }
  0xc4   :  { %v614_v26 = vadd.f32 %v1438_v44, %v546_v24  ;;  %v630_v27 = vadd.f32 %v1438_v44, %v562_v25 }
  0xc5   :  { %v709_v48 = vmax.f32 %v645_v38, 0.0  ;;  %v725_v49 = vmax.f32 %v661_v39, 0.0 }
  0xc6   :  { %v678_v32 = vmax.f32 %v614_v26, 0.0  ;;  %v694_v33 = vmax.f32 %v630_v27, 0.0 }
  0xc8   :  { %v1095_v34 = vpack.c.bf16 %v678_v32, %v677_v30  ;;  %v1135_v35 = vpack.c.bf16 %v694_v33, %v693_v31  ;;  %v466_v36 = vpop.f32.mrf.mxu2  ;;  %v506_v37 = vpop.f32.mrf.mxu3 }
  0xc9   :  { %v578_v40 = vmul.f32 %v1432_v42, %v466_v36  ;;  %v594_v41 = vmul.f32 %v1432_v42, %v506_v37  ;;  %v389_v43 = vpop.f32.mrf.mxu0  ;;  %v429_v45 = vpop.f32.mrf.mxu1 }
  0xca   :  { %1247 = vst [vmem:[#allocation7 + $0x8] sm:$0xff] %v1095_v34   ;;  %v547_v52 = vmul.f32 %v1432_v42, %v389_v43  ;;  %v563_v53 = vmul.f32 %v1432_v42, %v429_v45 }
  0xcb   :  { %1255 = vst [vmem:[#allocation7 + $0x48] sm:$0xff] %v1135_v35   ;;  %v646_v46 = vadd.f32 %v1438_v44, %v578_v40  ;;  %v662_v47 = vadd.f32 %v1438_v44, %v594_v41 }
  0xcc   :  { %v615_v60 = vadd.f32 %v1438_v44, %v547_v52  ;;  %v631_v61 = vadd.f32 %v1438_v44, %v563_v53 }
  0xcd   :  { %v710_v50 = vmax.f32 %v646_v46, 0.0  ;;  %v726_v51 = vmax.f32 %v662_v47, 0.0 }
  0xce   :  { %v679_v4 = vmax.f32 %v615_v60, 0.0  ;;  %v695_v5 = vmax.f32 %v631_v61, 0.0 }
  0xcf   :  { %v1175_v54 = vpack.c.bf16 %v710_v50, %v709_v48  ;;  %v1215_v55 = vpack.c.bf16 %v726_v51, %v725_v49 }
  0xd0   :  { %v469_v56 = vpop.f32.mrf.mxu2  ;;  %v509_v57 = vpop.f32.mrf.mxu3 }
  0xd1   :  { %1263 = vst [vmem:[#allocation7 + $0x88] sm:$0xff] %v1175_v54   ;;  %v391_v58 = vpop.f32.mrf.mxu0  ;;  %v431_v59 = vpop.f32.mrf.mxu1  ;;  %v579_v2 = vmul.f32 %v1432_v42, %v469_v56  ;;  %v595_v3 = vmul.f32 %v1432_v42, %v509_v57 }
  0xd2   :  { %1271 = vst [vmem:[#allocation7 + $0xc8] sm:$0xff] %v1215_v55   ;;  %v548_v62 = vmul.f32 %v1432_v42, %v391_v58  ;;  %v564_v63 = vmul.f32 %v1432_v42, %v431_v59 }
  0xd3   :  { %v647_v12 = vadd.f32 %v1438_v44, %v579_v2  ;;  %v663_v13 = vadd.f32 %v1438_v44, %v595_v3 }
  0xd4   :  { %v616_v0 = vadd.f32 %v1438_v44, %v548_v62  ;;  %v632_v1 = vadd.f32 %v1438_v44, %v564_v63 }
  0xd5   :  { %v711_v20 = vmax.f32 %v647_v12, 0.0  ;;  %v727_v21 = vmax.f32 %v663_v13, 0.0 }
  0xd6   :  { %v680_v6 = vmax.f32 %v616_v0, 0.0  ;;  %v696_v7 = vmax.f32 %v632_v1, 0.0 }
  0xd8   :  { %v1100_v8 = vpack.c.bf16 %v680_v6, %v679_v4  ;;  %v1140_v9 = vpack.c.bf16 %v696_v7, %v695_v5  ;;  %v471_v10 = vpop.f32.mrf.mxu2  ;;  %v511_v11 = vpop.f32.mrf.mxu3 }
  0xd9   :  { %v580_v14 = vmul.f32 %v1432_v42, %v471_v10  ;;  %v596_v15 = vmul.f32 %v1432_v42, %v511_v11  ;;  %v394_v16 = vpop.f32.mrf.mxu0  ;;  %v434_v17 = vpop.f32.mrf.mxu1 }
  0xda   :  { %1248 = vst [vmem:[#allocation7 + $0x10] sm:$0xff] %v1100_v8   ;;  %v549_v24 = vmul.f32 %v1432_v42, %v394_v16  ;;  %v565_v25 = vmul.f32 %v1432_v42, %v434_v17 }
  0xdb   :  { %1256 = vst [vmem:[#allocation7 + $0x50] sm:$0xff] %v1140_v9   ;;  %v648_v18 = vadd.f32 %v1438_v44, %v580_v14  ;;  %v664_v19 = vadd.f32 %v1438_v44, %v596_v15 }
  0xdc   :  { %v617_v32 = vadd.f32 %v1438_v44, %v549_v24  ;;  %v633_v33 = vadd.f32 %v1438_v44, %v565_v25 }
  0xdd   :  { %v712_v22 = vmax.f32 %v648_v18, 0.0  ;;  %v728_v23 = vmax.f32 %v664_v19, 0.0 }
  0xde   :  { %v681_v40 = vmax.f32 %v617_v32, 0.0  ;;  %v697_v41 = vmax.f32 %v633_v33, 0.0 }
  0xdf   :  { %v1180_v26 = vpack.c.bf16 %v712_v22, %v711_v20  ;;  %v1220_v27 = vpack.c.bf16 %v728_v23, %v727_v21 }
  0xe0   :  { %v474_v28 = vpop.f32.mrf.mxu2  ;;  %v514_v29 = vpop.f32.mrf.mxu3 }
  0xe1   :  { %1264 = vst [vmem:[#allocation7 + $0x90] sm:$0xff] %v1180_v26   ;;  %v396_v30 = vpop.f32.mrf.mxu0  ;;  %v436_v31 = vpop.f32.mrf.mxu1  ;;  %v581_v38 = vmul.f32 %v1432_v42, %v474_v28  ;;  %v597_v39 = vmul.f32 %v1432_v42, %v514_v29 }
  0xe2   :  { %1272 = vst [vmem:[#allocation7 + $0xd0] sm:$0xff] %v1220_v27   ;;  %v550_v34 = vmul.f32 %v1432_v42, %v396_v30  ;;  %v566_v35 = vmul.f32 %v1432_v42, %v436_v31 }
  0xe3   :  { %v649_v50 = vadd.f32 %v1438_v44, %v581_v38  ;;  %v665_v51 = vadd.f32 %v1438_v44, %v597_v39 }
  0xe4   :  { %v618_v36 = vadd.f32 %v1438_v44, %v550_v34  ;;  %v634_v37 = vadd.f32 %v1438_v44, %v566_v35 }
  0xe5   :  { %v713_v58 = vmax.f32 %v649_v50, 0.0  ;;  %v729_v59 = vmax.f32 %v665_v51, 0.0 }
  0xe6   :  { %v682_v43 = vmax.f32 %v618_v36, 0.0  ;;  %v698_v45 = vmax.f32 %v634_v37, 0.0 }
  0xe8   :  { %v1105_v46 = vpack.c.bf16 %v682_v43, %v681_v40  ;;  %v1145_v47 = vpack.c.bf16 %v698_v45, %v697_v41  ;;  %v476_v48 = vpop.f32.mrf.mxu2  ;;  %v516_v49 = vpop.f32.mrf.mxu3 }
  0xe9   :  { %v582_v52 = vmul.f32 %v1432_v42, %v476_v48  ;;  %v598_v53 = vmul.f32 %v1432_v42, %v516_v49  ;;  %v399_v54 = vpop.f32.mrf.mxu0  ;;  %v439_v55 = vpop.f32.mrf.mxu1 }
  0xea   :  { %1249 = vst [vmem:[#allocation7 + $0x18] sm:$0xff] %v1105_v46   ;;  %v551_v62 = vmul.f32 %v1432_v42, %v399_v54  ;;  %v567_v63 = vmul.f32 %v1432_v42, %v439_v55 }
  0xeb   :  { %1257 = vst [vmem:[#allocation7 + $0x58] sm:$0xff] %v1145_v47   ;;  %v650_v56 = vadd.f32 %v1438_v44, %v582_v52  ;;  %v666_v57 = vadd.f32 %v1438_v44, %v598_v53 }
  0xec   :  { %v619_v6 = vadd.f32 %v1438_v44, %v551_v62  ;;  %v635_v7 = vadd.f32 %v1438_v44, %v567_v63 }
  0xed   :  { %v714_v60 = vmax.f32 %v650_v56, 0.0  ;;  %v730_v61 = vmax.f32 %v666_v57, 0.0 }
  0xee   :  { %v683_v14 = vmax.f32 %v619_v6, 0.0  ;;  %v699_v15 = vmax.f32 %v635_v7, 0.0 }
  0xef   :  { %v1185_v0 = vpack.c.bf16 %v714_v60, %v713_v58  ;;  %v1225_v1 = vpack.c.bf16 %v730_v61, %v729_v59 }
  0xf0   :  { %v479_v2 = vpop.f32.mrf.mxu2  ;;  %v519_v3 = vpop.f32.mrf.mxu3 }
  0xf1   :  { %1265 = vst [vmem:[#allocation7 + $0x98] sm:$0xff] %v1185_v0   ;;  %v401_v4 = vpop.f32.mrf.mxu0  ;;  %v441_v5 = vpop.f32.mrf.mxu1  ;;  %v583_v12 = vmul.f32 %v1432_v42, %v479_v2  ;;  %v599_v13 = vmul.f32 %v1432_v42, %v519_v3 }
  0xf2   :  { %1273 = vst [vmem:[#allocation7 + $0xd8] sm:$0xff] %v1225_v1   ;;  %v552_v8 = vmul.f32 %v1432_v42, %v401_v4  ;;  %v568_v9 = vmul.f32 %v1432_v42, %v441_v5 }
  0xf3   :  { %v651_v22 = vadd.f32 %v1438_v44, %v583_v12  ;;  %v667_v23 = vadd.f32 %v1438_v44, %v599_v13 }
  0xf4   :  { %v620_v10 = vadd.f32 %v1438_v44, %v552_v8  ;;  %v636_v11 = vadd.f32 %v1438_v44, %v568_v9 }
  0xf5   :  { %v715_v30 = vmax.f32 %v651_v22, 0.0  ;;  %v731_v31 = vmax.f32 %v667_v23, 0.0 }
  0xf6   :  { %v684_v16 = vmax.f32 %v620_v10, 0.0  ;;  %v700_v17 = vmax.f32 %v636_v11, 0.0 }
  0xf8   :  { %v1110_v18 = vpack.c.bf16 %v684_v16, %v683_v14  ;;  %v1150_v19 = vpack.c.bf16 %v700_v17, %v699_v15  ;;  %v481_v20 = vpop.f32.mrf.mxu2  ;;  %v521_v21 = vpop.f32.mrf.mxu3 }
  0xf9   :  { %v584_v24 = vmul.f32 %v1432_v42, %v481_v20  ;;  %v600_v25 = vmul.f32 %v1432_v42, %v521_v21  ;;  %v404_v26 = vpop.f32.mrf.mxu0  ;;  %v444_v27 = vpop.f32.mrf.mxu1 }
  0xfa   :  { %1250 = vst [vmem:[#allocation7 + $0x20] sm:$0xff] %v1110_v18   ;;  %v553_v34 = vmul.f32 %v1432_v42, %v404_v26  ;;  %v569_v35 = vmul.f32 %v1432_v42, %v444_v27 }
  0xfb   :  { %1258 = vst [vmem:[#allocation7 + $0x60] sm:$0xff] %v1150_v19   ;;  %v652_v28 = vadd.f32 %v1438_v44, %v584_v24  ;;  %v668_v29 = vadd.f32 %v1438_v44, %v600_v25 }
  0xfc   :  { %v621_v43 = vadd.f32 %v1438_v44, %v553_v34  ;;  %v637_v45 = vadd.f32 %v1438_v44, %v569_v35 }
  0xfd   :  { %v716_v32 = vmax.f32 %v652_v28, 0.0  ;;  %v732_v33 = vmax.f32 %v668_v29, 0.0 }
  0xfe   :  { %v685_v52 = vmax.f32 %v621_v43, 0.0  ;;  %v701_v53 = vmax.f32 %v637_v45, 0.0 }
  0xff   :  { %v1190_v36 = vpack.c.bf16 %v716_v32, %v715_v30  ;;  %v1230_v37 = vpack.c.bf16 %v732_v33, %v731_v31 }
 0x100   :  { %v484_v38 = vpop.f32.mrf.mxu2  ;;  %v524_v39 = vpop.f32.mrf.mxu3 }
 0x101   :  { %1266 = vst [vmem:[#allocation7 + $0xa0] sm:$0xff] %v1190_v36   ;;  %v406_v40 = vpop.f32.mrf.mxu0  ;;  %v446_v41 = vpop.f32.mrf.mxu1  ;;  %v585_v50 = vmul.f32 %v1432_v42, %v484_v38  ;;  %v601_v51 = vmul.f32 %v1432_v42, %v524_v39 }
 0x102   :  { %1274 = vst [vmem:[#allocation7 + $0xe0] sm:$0xff] %v1230_v37   ;;  %v554_v46 = vmul.f32 %v1432_v42, %v406_v40  ;;  %v570_v47 = vmul.f32 %v1432_v42, %v446_v41 }
 0x103   :  { %v653_v60 = vadd.f32 %v1438_v44, %v585_v50  ;;  %v669_v61 = vadd.f32 %v1438_v44, %v601_v51 }
 0x104   :  { %v622_v48 = vadd.f32 %v1438_v44, %v554_v46  ;;  %v638_v49 = vadd.f32 %v1438_v44, %v570_v47 }
 0x105   :  { %v717_v4 = vmax.f32 %v653_v60, 0.0  ;;  %v733_v5 = vmax.f32 %v669_v61, 0.0 }
 0x106   :  { %v686_v54 = vmax.f32 %v622_v48, 0.0  ;;  %v702_v55 = vmax.f32 %v638_v49, 0.0 }
 0x108   :  { %v1115_v56 = vpack.c.bf16 %v686_v54, %v685_v52  ;;  %v1155_v57 = vpack.c.bf16 %v702_v55, %v701_v53  ;;  %v486_v58 = vpop.f32.mrf.mxu2  ;;  %v526_v59 = vpop.f32.mrf.mxu3 }
 0x109   :  { %v586_v62 = vmul.f32 %v1432_v42, %v486_v58  ;;  %v602_v63 = vmul.f32 %v1432_v42, %v526_v59  ;;  %v409_v0 = vpop.f32.mrf.mxu0  ;;  %v449_v1 = vpop.f32.mrf.mxu1 }
 0x10a   :  { %1251 = vst [vmem:[#allocation7 + $0x28] sm:$0xff] %v1115_v56   ;;  %v555_v8 = vmul.f32 %v1432_v42, %v409_v0  ;;  %v571_v9 = vmul.f32 %v1432_v42, %v449_v1 }
 0x10b   :  { %1259 = vst [vmem:[#allocation7 + $0x68] sm:$0xff] %v1155_v57   ;;  %v654_v2 = vadd.f32 %v1438_v44, %v586_v62  ;;  %v670_v3 = vadd.f32 %v1438_v44, %v602_v63 }
 0x10c   :  { %v623_v16 = vadd.f32 %v1438_v44, %v555_v8  ;;  %v639_v17 = vadd.f32 %v1438_v44, %v571_v9 }
 0x10d   :  { %v718_v6 = vmax.f32 %v654_v2, 0.0  ;;  %v734_v7 = vmax.f32 %v670_v3, 0.0 }
 0x10e   :  { %v687_v24 = vmax.f32 %v623_v16, 0.0  ;;  %v703_v25 = vmax.f32 %v639_v17, 0.0 }
 0x10f   :  { %v1195_v10 = vpack.c.bf16 %v718_v6, %v717_v4  ;;  %v1235_v11 = vpack.c.bf16 %v734_v7, %v733_v5 }
 0x110   :  { %v489_v12 = vpop.f32.mrf.mxu2  ;;  %v529_v13 = vpop.f32.mrf.mxu3 }
 0x111   :  { %1267 = vst [vmem:[#allocation7 + $0xa8] sm:$0xff] %v1195_v10   ;;  %v411_v14 = vpop.f32.mrf.mxu0  ;;  %v451_v15 = vpop.f32.mrf.mxu1  ;;  %v587_v22 = vmul.f32 %v1432_v42, %v489_v12  ;;  %v603_v23 = vmul.f32 %v1432_v42, %v529_v13 }
 0x112   :  { %1275 = vst [vmem:[#allocation7 + $0xe8] sm:$0xff] %v1235_v11   ;;  %v556_v18 = vmul.f32 %v1432_v42, %v411_v14  ;;  %v572_v19 = vmul.f32 %v1432_v42, %v451_v15 }
 0x113   :  { %v655_v32 = vadd.f32 %v1438_v44, %v587_v22  ;;  %v671_v33 = vadd.f32 %v1438_v44, %v603_v23 }
 0x114   :  { %v624_v20 = vadd.f32 %v1438_v44, %v556_v18  ;;  %v640_v21 = vadd.f32 %v1438_v44, %v572_v19 }
 0x115   :  { %v719_v40 = vmax.f32 %v655_v32, 0.0  ;;  %v735_v41 = vmax.f32 %v671_v33, 0.0 }
 0x116   :  { %v688_v26 = vmax.f32 %v624_v20, 0.0  ;;  %v704_v27 = vmax.f32 %v640_v21, 0.0 }
 0x118   :  { %v1120_v28 = vpack.c.bf16 %v688_v26, %v687_v24  ;;  %v1160_v29 = vpack.c.bf16 %v704_v27, %v703_v25  ;;  %v491_v30 = vpop.f32.mrf.mxu2  ;;  %v531_v31 = vpop.f32.mrf.mxu3 }
 0x119   :  { %v588_v34 = vmul.f32 %v1432_v42, %v491_v30  ;;  %v604_v35 = vmul.f32 %v1432_v42, %v531_v31  ;;  %v414_v36 = vpop.f32.mrf.mxu0  ;;  %v454_v37 = vpop.f32.mrf.mxu1 }
 0x11a   :  { %1252 = vst [vmem:[#allocation7 + $0x30] sm:$0xff] %v1120_v28   ;;  %v557_v46 = vmul.f32 %v1432_v42, %v414_v36  ;;  %v573_v47 = vmul.f32 %v1432_v42, %v454_v37 }
 0x11b   :  { %1260 = vst [vmem:[#allocation7 + $0x70] sm:$0xff] %v1160_v29   ;;  %v656_v38 = vadd.f32 %v1438_v44, %v588_v34  ;;  %v672_v39 = vadd.f32 %v1438_v44, %v604_v35 }
 0x11c   :  { %v625_v54 = vadd.f32 %v1438_v44, %v557_v46  ;;  %v641_v55 = vadd.f32 %v1438_v44, %v573_v47 }
 0x11d   :  { %v720_v43 = vmax.f32 %v656_v38, 0.0  ;;  %v736_v45 = vmax.f32 %v672_v39, 0.0 }
 0x11e   :  { %v689_v62 = vmax.f32 %v625_v54, 0.0  ;;  %v705_v63 = vmax.f32 %v641_v55, 0.0 }
 0x11f   :  { %v1200_v48 = vpack.c.bf16 %v720_v43, %v719_v40  ;;  %v1240_v49 = vpack.c.bf16 %v736_v45, %v735_v41 }
 0x120   :  { %v494_v50 = vpop.f32.mrf.mxu2  ;;  %v534_v51 = vpop.f32.mrf.mxu3 }
 0x121   :  { %1268 = vst [vmem:[#allocation7 + $0xb0] sm:$0xff] %v1200_v48   ;;  %v416_v52 = vpop.f32.mrf.mxu0  ;;  %v456_v53 = vpop.f32.mrf.mxu1  ;;  %v589_v60 = vmul.f32 %v1432_v42, %v494_v50  ;;  %v605_v61 = vmul.f32 %v1432_v42, %v534_v51 }
 0x122   :  { %1276 = vst [vmem:[#allocation7 + $0xf0] sm:$0xff] %v1240_v49   ;;  %v558_v56 = vmul.f32 %v1432_v42, %v416_v52  ;;  %v574_v57 = vmul.f32 %v1432_v42, %v456_v53 }
 0x123   :  { %v657_v6 = vadd.f32 %v1438_v44, %v589_v60  ;;  %v673_v7 = vadd.f32 %v1438_v44, %v605_v61 }
 0x124   :  { %v626_v58 = vadd.f32 %v1438_v44, %v558_v56  ;;  %v642_v59 = vadd.f32 %v1438_v44, %v574_v57 }
 0x125   :  { %v721_v12 = vmax.f32 %v657_v6, 0.0  ;;  %v737_v13 = vmax.f32 %v673_v7, 0.0 }
 0x126   :  { %v690_v0 = vmax.f32 %v626_v58, 0.0  ;;  %v706_v1 = vmax.f32 %v642_v59, 0.0 }
 0x128   :  { %v1125_v2 = vpack.c.bf16 %v690_v0, %v689_v62  ;;  %v1165_v3 = vpack.c.bf16 %v706_v1, %v705_v63  ;;  %v496_v4 = vpop.f32.mrf.mxu2  ;;  %v536_v5 = vpop.f32.mrf.mxu3 }
 0x129   :  { %v590_v8 = vmul.f32 %v1432_v42, %v496_v4  ;;  %v606_v9 = vmul.f32 %v1432_v42, %v536_v5 }
 0x12a   :  { %1253 = vst [vmem:[#allocation7 + $0x38] sm:$0xff] %v1125_v2  }
 0x12b   :  { %1261 = vst [vmem:[#allocation7 + $0x78] sm:$0xff] %v1165_v3   ;;  %v658_v10 = vadd.f32 %v1438_v44, %v590_v8  ;;  %v674_v11 = vadd.f32 %v1438_v44, %v606_v9 }
 0x12d   :  { %v722_v14 = vmax.f32 %v658_v10, 0.0  ;;  %v738_v15 = vmax.f32 %v674_v11, 0.0 }
 0x12f   :  { %v1205_v16 = vpack.c.bf16 %v722_v14, %v721_v12  ;;  %v1245_v17 = vpack.c.bf16 %v738_v15, %v737_v13 }
 0x131   :  { %1269 = vst [vmem:[#allocation7 + $0xb8] sm:$0xff] %v1205_v16  }
 0x132   :  { %1277 = vst [vmem:[#allocation7 + $0xf8] sm:$0xff] %v1245_v17  }
 0x133   :  { %879 = dma.vmem_to_hbm [thread:$0]  %s872_s3, 4096, %s874_s5, [#allocation4], %s1388_s23, %s1388_s23, %s1389_s24  }
 0x134   :  { %1385 = dma.done.wait [#allocation4], 4096  }
 0x135   :  { %1386 = vsyncadd [#allocation4], 4294963200 }
 0x136   :  { %884 = vsyncpa [#allocation3], 1 }
 0x137   :  { %885 = vsyncpa [#allocation6], 1 }
 0x138   :  { %886 = vsyncpa [#allocation4], 1 }

</bundles_post_ra>
